<compile_context>
chip_gen: v5e
topology: v5e:2x2
jax: 0.10.0
libtpu: 0.0.40
codegen_flags: <defaults>
</compile_context>

<pallas_src>
import jax
import jax.numpy as jnp
from jax.experimental import pallas as pl
from jax.experimental.pallas import tpu as pltpu


def _frozen_bn_kernel(x_ref, s_ref, b_ref, o_ref):
    # x_ref: (tm, tn) tile of the lane-dense 2-D view.
    # s_ref/b_ref: either (tm, 1) per-row columns (broadcast across lanes) or
    # (1, tn) per-element plane (broadcast across sublanes).  Cast the tiny
    # scale/bias tile to the input dtype so the FMA stays in x.dtype.
    dt = x_ref.dtype
    o_ref[...] = (x_ref[...] * s_ref[...].astype(dt)
                  + b_ref[...].astype(dt)).astype(o_ref.dtype)


def _round_up(x, m):
    return ((x + m - 1) // m) * m


def _sublane_multiple(dtype):
    # Natural sublane packing: 8 rows/vreg for 4-byte, 16 for 2-byte, 32 for 1-byte.
    return {4: 8, 2: 16, 1: 32}.get(jnp.dtype(dtype).itemsize, 8)


def frozen_batch_norm_2d(x_nchw, weight, bias, running_mean, running_var,
                         *, x_tile_bytes=4 * 1024 * 1024):
    """x_nchw: (N, C, H, W); params/buffers: (C,). Returns (N, C, H, W)."""
    N, C, H, W = x_nchw.shape
    dtype = x_nchw.dtype
    itemsize = jnp.dtype(dtype).itemsize
    sub = _sublane_multiple(dtype)
    hw = H * W

    # Hoisted per-channel affine (f32 for stability; eps added before rsqrt as
    # in the PyTorch module).  Kept as f32 arrays; cast to x.dtype in-kernel.
    eps = 1e-05
    scale_c = weight.astype(jnp.float32) * jax.lax.rsqrt(
        running_var.astype(jnp.float32) + eps)
    bias_c = bias.astype(jnp.float32) - running_mean.astype(jnp.float32) * scale_c

    # --- choose a lane-dense 2-D view (no data movement, row-major reshapes) ---
    lane_dense_hw = (hw >= 128) and (hw % 128 == 0)
    if lane_dense_hw:
        # (N*C, H*W): row r corresponds to channel r % C.
        rows, cols = N * C, hw
        x2d = x_nchw.reshape(rows, cols)
        s2d = jnp.tile(scale_c, N).reshape(rows, 1)
        b2d = jnp.tile(bias_c, N).reshape(rows, 1)
        sb_per_row = True
    else:
        # Small/ragged H*W: (N, C*H*W) view with a per-element scale/bias plane
        # (only C*H*W*4 bytes) broadcast over the N rows.  Keeps stores
        # full-lane instead of 49/128-style masked stores.
        rows, cols = N, C * hw
        x2d = x_nchw.reshape(rows, cols)
        s2d = jnp.broadcast_to(scale_c[:, None], (C, hw)).reshape(1, cols)
        b2d = jnp.broadcast_to(bias_c[:, None], (C, hw)).reshape(1, cols)
        sb_per_row = False

    rows_pad = _round_up(rows, sub)
    cols_pad = _round_up(cols, 128)
    full_col_row_bytes = cols_pad * itemsize

    if full_col_row_bytes <= x_tile_bytes:
        # Preferred path: one block spans the whole column axis -> contiguous
        # per-tile HBM DMAs and a 1-D grid over rows.
        tn = cols_pad
        tm = max(sub, (x_tile_bytes // full_col_row_bytes) // sub * sub)
        tm = min(tm, rows_pad)
        grid = (pl.cdiv(rows, tm),)
        x_spec = pl.BlockSpec((tm, tn), lambda i: (i, 0))
        o_spec = pl.BlockSpec((tm, tn), lambda i: (i, 0))
        if sb_per_row:
            sb_spec = pl.BlockSpec((tm, 1), lambda i: (i, 0))
        else:
            sb_spec = pl.BlockSpec((1, tn), lambda i: (0, 0))
        dims = ("parallel",)
    else:
        # Fallback for very large column extents: 2-D grid.
        tm = min(rows_pad, 256)
        tn = min(cols_pad,
                 max(128, (x_tile_bytes // (tm * itemsize)) // 128 * 128))
        grid = (pl.cdiv(rows, tm), pl.cdiv(cols, tn))
        x_spec = pl.BlockSpec((tm, tn), lambda i, j: (i, j))
        o_spec = pl.BlockSpec((tm, tn), lambda i, j: (i, j))
        if sb_per_row:
            sb_spec = pl.BlockSpec((tm, 1), lambda i, j: (i, 0))
        else:
            sb_spec = pl.BlockSpec((1, tn), lambda i, j: (0, j))
        dims = ("parallel", "parallel")

    out2d = pl.pallas_call(
        _frozen_bn_kernel,
        out_shape=jax.ShapeDtypeStruct((rows, cols), dtype),
        grid_spec=pltpu.PrefetchScalarGridSpec(
            num_scalar_prefetch=0,
            grid=grid,
            in_specs=[x_spec, sb_spec, sb_spec],
            out_specs=o_spec,
        ),
        compiler_params=pltpu.CompilerParams(
            dimension_semantics=dims,
            # Raises v5e's 16 MiB scoped default so 4 MiB x tiles (double
            # buffered in+out ~16-18 MiB total) compile everywhere; well below
            # v7x's 64 MiB physical VMEM.
            vmem_limit_bytes=32 * 1024 * 1024,
        ),
    )(x2d, s2d, b2d)

    # Free row-major reshape back to NCHW (both views are row-major compatible).
    return out2d.reshape(N, C, H, W)


def _reference(x, w, b, rm, rv):
    eps = 1e-05
    scale = (w * jax.lax.rsqrt(rv + eps)).reshape(1, -1, 1, 1)
    bias = (b - rm * (w * jax.lax.rsqrt(rv + eps))).reshape(1, -1, 1, 1)
    return x * scale + bias


if __name__ == "__main__":
    key = jax.random.PRNGKey(0)
    kx, kw, kb, km, kv = jax.random.split(key, 5)

    # Case 1: H*W multiple of 128 -> (N*C, H*W) per-row path, 1-D grid.
    N, C, H, W = 2, 4, 16, 16
    x = jax.random.normal(kx, (N, C, H, W), dtype=jnp.float32)
    weight = 1.0 + 0.1 * jax.random.normal(kw, (C,), dtype=jnp.float32)
    bias = 0.1 * jax.random.normal(kb, (C,), dtype=jnp.float32)
    running_mean = 0.05 * jax.random.normal(km, (C,), dtype=jnp.float32)
    running_var = jnp.abs(1.0 + 0.1 * jax.random.normal(kv, (C,), dtype=jnp.float32))

    out = jax.block_until_ready(
        frozen_batch_norm_2d(x, weight, bias, running_mean, running_var))
    ref = _reference(x, weight, bias, running_mean, running_var)
    assert out.shape == (N, C, H, W)
    assert jnp.allclose(out, ref, atol=1e-5, rtol=1e-5), "mismatch (aligned case)"

    # Case 2: ragged H*W (not a multiple of 128) -> (N, C*H*W) plane path.
    N2, C2, H2, W2 = 2, 3, 13, 20
    x2 = jax.random.normal(kx, (N2, C2, H2, W2), dtype=jnp.float32)
    w2 = 1.0 + 0.1 * jax.random.normal(kw, (C2,), dtype=jnp.float32)
    b2 = 0.1 * jax.random.normal(kb, (C2,), dtype=jnp.float32)
    rm2 = 0.05 * jax.random.normal(km, (C2,), dtype=jnp.float32)
    rv2 = jnp.abs(1.0 + 0.1 * jax.random.normal(kv, (C2,), dtype=jnp.float32))
    out2 = jax.block_until_ready(frozen_batch_norm_2d(x2, w2, b2, rm2, rv2))
    assert jnp.allclose(out2, _reference(x2, w2, b2, rm2, rv2),
                        atol=1e-5, rtol=1e-5), "mismatch (ragged case)"

    # Case 3: bf16 input (in-dtype FMA, 16-row sublane alignment).
    xb = x.astype(jnp.bfloat16)
    outb = jax.block_until_ready(
        frozen_batch_norm_2d(xb, weight, bias, running_mean, running_var))
    refb = _reference(x, weight, bias, running_mean, running_var)
    assert outb.dtype == jnp.bfloat16
    assert jnp.allclose(outb.astype(jnp.float32), refb, atol=5e-2, rtol=5e-2), \
        "mismatch (bf16 case)"

    print("KERNEL_OK")
</pallas_src>

<mosaic_0001>
module attributes {stable_mosaic.version = 11 : i64} {
  func.func @_frozen_bn_kernel(%arg0: i32, %arg1: memref<8x256xf32, #tpu.memory_space<vmem>>, %arg2: memref<8x1xf32, #tpu.memory_space<vmem>>, %arg3: memref<8x1xf32, #tpu.memory_space<vmem>>, %arg4: memref<8x256xf32, #tpu.memory_space<vmem>>) attributes {dimension_semantics = [#tpu.dimension_semantics<parallel>], iteration_bounds = array<i64: 1>, scalar_prefetch = 0 : i64, scratch_operands = 0 : i64, tpu.core_type = #tpu.core_type<tc>, window_params = [{transform_indices = @transform_0, window_bounds = array<i64: 8, 256>}, {transform_indices = @transform_1, window_bounds = array<i64: 8, 1>}, {transform_indices = @transform_2, window_bounds = array<i64: 8, 1>}, {transform_indices = @transform_3, window_bounds = array<i64: 8, 256>}]} {
    %c0 = arith.constant 0 : index
    %c0_0 = arith.constant 0 : index
    %0 = vector.load %arg1[%c0, %c0_0] : memref<8x256xf32, #tpu.memory_space<vmem>>, vector<8x256xf32>
    %c0_1 = arith.constant 0 : index
    %c0_2 = arith.constant 0 : index
    %1 = vector.load %arg2[%c0_1, %c0_2] : memref<8x1xf32, #tpu.memory_space<vmem>>, vector<8x1xf32>
    %2 = vector.broadcast %1 : vector<8x1xf32> to vector<8x256xf32>
    %3 = arith.mulf %0, %2 : vector<8x256xf32>
    %c0_3 = arith.constant 0 : index
    %c0_4 = arith.constant 0 : index
    %4 = vector.load %arg3[%c0_3, %c0_4] : memref<8x1xf32, #tpu.memory_space<vmem>>, vector<8x1xf32>
    %5 = vector.broadcast %4 : vector<8x1xf32> to vector<8x256xf32>
    %6 = arith.addf %3, %5 : vector<8x256xf32>
    %c0_5 = arith.constant 0 : index
    %c0_6 = arith.constant 0 : index
    %7 = vector.load %arg4[%c0_5, %c0_6] : memref<8x256xf32, #tpu.memory_space<vmem>>, vector<8x256xf32>
    tpu.vector_store %arg4[%c0_5, %c0_6], %6 {strides = array<i32>} : memref<8x256xf32, #tpu.memory_space<vmem>>, vector<8x256xf32>,
    return
  }
  func.func @transform_0(%arg0: i32) -> (i32, i32) {
    %c0_i32 = arith.constant 0 : i32
    %c0_i32_0 = arith.constant 0 : i32
    return %arg0, %c0_i32 : i32, i32
  }
  func.func @transform_1(%arg0: i32) -> (i32, i32) {
    %c0_i32 = arith.constant 0 : i32
    %c0_i32_0 = arith.constant 0 : i32
    return %arg0, %c0_i32 : i32, i32
  }
  func.func @transform_2(%arg0: i32) -> (i32, i32) {
    %c0_i32 = arith.constant 0 : i32
    %c0_i32_0 = arith.constant 0 : i32
    return %arg0, %c0_i32 : i32, i32
  }
  func.func @transform_3(%arg0: i32) -> (i32, i32) {
    %c0_i32 = arith.constant 0 : i32
    %c0_i32_0 = arith.constant 0 : i32
    return %arg0, %c0_i32 : i32, i32
  }
}

</mosaic_0001>

<bundles_post_ra>
// kernel: tpu_custom_call.1
= control target key start
LH: loop header
LB: loop body
LE: loop exit
PB: predicated region body
PF: predicated region fallthrough
CT: control target
= control target key end

     0   :  { %s117_s0 = inlined_call_operand.vmem [shape: f32[8,256], index: 0, kind: input, shape index: {}]   ;;  %s118_s1 = inlined_call_operand.vmem [shape: f32[8,1], index: 1, kind: input, shape index: {}]   ;;  %s119_s2 = inlined_call_operand.vmem [shape: f32[8,1], index: 2, kind: input, shape index: {}]   ;;  %s120_s3 = inlined_call_operand.hbm [shape: f32[8,256], index: 3, kind: output, shape index: {}]  }
   0x1   :  { %v17_v0 = vld [vmem:[%s118_s1] sm:$0xff] }
   0x2   :  { %8 = vsyncpa [#allocation3], 0  ;;  %v80_v1 = vmov 0   ;;  %v25_v2 = vld [vmem:[%s119_s2] sm:$0xff]  ;;  %v16_v5 = vld [vmem:[%s117_s0 + $0x8] sm:$0xff]  ;;  %s81_s1 = smov [#allocation2]  }
   0x3   :  { %53 = vset.pattern.permute.xlu0 %v80_v1  ;;  %v15_v4 = vld [vmem:[%s117_s0] sm:$0xff]  ;;  %s40_s20 = sshll.u32 %s81_s1, 4  ;;  %s42_s23 = sshll.u32 %s120_s3, 4  ;;  %s41_s20 = int_to_ptr.vmem [resolvable:$true] %s40_s20  ;;  %s43_s23 = int_to_ptr.hbm [resolvable:$true] %s42_s23 }
   0x4   :  { %20 = vperm.xlu0 %53, %v17_v0  }
   0xc   :  { %28 = vperm.xlu0 %53, %v25_v2  }
  0x76   :  { %v21_v3 = vpop.permute.xlu0 %20 }
  0x77   :  { %v23_v6 = vmul.f32 %v21_v3, %v15_v4  ;;  %v24_v7 = vmul.f32 %v21_v3, %v16_v5 }
  0x7e   :  { %v29_v8 = vpop.permute.xlu0 %28 }
  0x7f   :  { %v31_v9 = vadd.f32 %v29_v8, %v23_v6  ;;  %v32_v10 = vadd.f32 %v29_v8, %v24_v7 }
  0x81   :  { %33 = vst [vmem:[#allocation2] sm:$0xff] %v31_v9 }
  0x82   :  { %34 = vst [vmem:[#allocation2 + $0x8] sm:$0xff] %v32_v10 }
  0x83   :  { %45 = dma.vmem_to_hbm [thread:$0]  %s41_s20, 256, %s43_s23, [#allocation3]  }
  0x84   :  { %78 = dma.done.wait [#allocation3], 256  }
  0x85   :  { %79 = vsyncadd [#allocation3], 4294967040 }
  0x86   :  { %50 = vsyncpa [#allocation3], 1 }

</bundles_post_ra>
